<compile_context>
chip_gen: v7x
topology: tpu7x:2x2x1
jax: 0.10.0
libtpu: 0.0.40
codegen_flags: <defaults>
</compile_context>

<pallas_src>
import jax
import jax.numpy as jnp
from jax.experimental import pallas as pl
from jax.experimental.pallas import tpu as pltpu


def _round_up(x, m):
    return ((x + m - 1) // m) * m


def _proj_kernel(x_ref, w_ref, b_ref, o_ref):
    # x_ref: (tm, Cin) input dtype   w_ref: (Cin, Cout) bf16
    # b_ref: (1, Cout) f32           o_ref: (tm, Cout)
    x_b = x_ref[...].astype(jnp.bfloat16)          # cast in-kernel, hidden under DMA
    acc = jnp.dot(x_b, w_ref[...], preferred_element_type=jnp.float32)
    o_ref[...] = (acc + b_ref[...]).astype(o_ref.dtype)


def _pick_tm(M, Cin, Cout, x_bytes, out_bytes, *, tm_max=512, vmem_budget=40 << 20):
    """Row tile: big enough to amortize grid overhead, small enough for v7x VMEM,
    and producing >=2 row tiles so both v7x TensorCores get work."""
    tm = min(tm_max, _round_up(M, 8))
    if M > 8 and -(-M // tm) < 2:                  # force >=2 row tiles when possible
        tm = _round_up(-(-M // 2), 8)
    while tm > 8:                                  # double-buffered working set
        need = (2 * tm * Cin * x_bytes            # x blocks
                + 2 * Cin * Cout * 2              # weight (bf16)
                + 2 * Cout * 4                    # bias (f32)
                + 2 * tm * Cout * out_bytes)      # output blocks
        if need <= vmem_budget:
            break
        tm //= 2
    return max(8, tm)


def _pallas_pointwise_proj(x2d, w_bf16, bias_f32, out_dtype):
    """x2d: (M, Cin) any float dtype, w_bf16: (Cin, Cout) bf16, bias_f32: (Cout,) f32
    -> (M, Cout) in out_dtype. No padding / extra HBM passes."""
    M, Cin = x2d.shape
    Cout = w_bf16.shape[1]

    x_bytes = jnp.dtype(x2d.dtype).itemsize
    out_bytes = jnp.dtype(out_dtype).itemsize
    tm = _pick_tm(M, Cin, Cout, x_bytes, out_bytes)

    b2 = bias_f32.reshape(1, Cout)
    grid = (pl.cdiv(M, tm),)                       # ragged last tile: masked stores

    return pl.pallas_call(
        _proj_kernel,
        out_shape=jax.ShapeDtypeStruct((M, Cout), out_dtype),
        grid_spec=pl.GridSpec(
            grid=grid,
            in_specs=[
                # x: stream row tiles, full Cin extent (no lane padding needed).
                pl.BlockSpec((tm, Cin), lambda i: (i, 0)),
                # weight / bias: constant block index -> DMA'd once, VMEM-resident.
                pl.BlockSpec((Cin, Cout), lambda i: (0, 0)),
                pl.BlockSpec((1, Cout), lambda i: (0, 0)),
            ],
            out_specs=pl.BlockSpec((tm, Cout), lambda i: (i, 0)),
        ),
        compiler_params=pltpu.CompilerParams(
            dimension_semantics=("parallel",),     # row tiles split across TCs (v7x)
            vmem_limit_bytes=48 << 20,             # headroom under v7x's 64 MiB VMEM
        ),
    )(x2d, w_bf16, b2)


def visual_projection_forward(visual_features, weight, bias, drop_rate=0.0):
    """VisualProjection.forward (inference).

    visual_features: (B, L, visual_dim)
    weight: (dim, visual_dim, 1)   -- nn.Conv1d weight layout (kernel_size=1)
    bias:   (dim,)
    returns (B, L, dim)
    """
    # TODO(synk): Dropout is identity at inference / drop_rate=0.0 (module default);
    # training-mode stochastic dropout is not implemented here.
    del drop_rate

    B, L, Cin = visual_features.shape
    Cout, Cin_w, K = weight.shape
    assert Cin == Cin_w and K == 1, "VisualProjection uses a kernel_size=1 Conv1D"

    # kernel_size=1 conv == pointwise linear: just a reshape, no im2col.
    x2d = visual_features.reshape(B * L, Cin)
    # Tiny per-call transform of the (small) weight; activations are untouched.
    w_bf16 = weight[:, :, 0].T.astype(jnp.bfloat16)   # (Cin, Cout)
    b_f32 = bias.astype(jnp.float32)

    y = _pallas_pointwise_proj(x2d, w_bf16, b_f32, visual_features.dtype)
    return y.reshape(B, L, Cout)


if __name__ == "__main__":
    # VisualProjection(visual_dim=32, dim=16), inputs (B=2, L=8, visual_dim=32)
    B, L, visual_dim, dim = 2, 8, 32, 16

    key = jax.random.PRNGKey(0)
    kx, kw, kb = jax.random.split(key, 3)

    x = jax.random.normal(kx, (B, L, visual_dim), dtype=jnp.float32)
    fan_in = visual_dim  # kernel_size = 1
    bound = 1.0 / (fan_in ** 0.5)
    weight = jax.random.uniform(kw, (dim, visual_dim, 1), dtype=jnp.float32,
                                minval=-bound, maxval=bound)
    bias = jax.random.uniform(kb, (dim,), dtype=jnp.float32,
                              minval=-bound, maxval=bound)

    y = visual_projection_forward(x, weight, bias)
    y = jax.block_until_ready(y)
    assert y.shape == (B, L, dim), y.shape

    # Reference 1: exact same numerics path (bf16 inputs, f32 accumulate).
    xb = x.astype(jnp.bfloat16).astype(jnp.float32).reshape(B * L, visual_dim)
    wb = weight[:, :, 0].T.astype(jnp.bfloat16).astype(jnp.float32)
    ref_b = (jnp.dot(xb, wb, precision=jax.lax.Precision.HIGHEST)
             + bias[None, :]).reshape(B, L, dim)
    assert jnp.allclose(y, ref_b, atol=1e-4, rtol=1e-4)

    # Reference 2: pure f32 module semantics (covers the bf16 cast error).
    ref_f = jnp.einsum("blc,oc->blo", x, weight[:, :, 0]) + bias[None, None, :]
    assert jnp.allclose(y, ref_f, atol=5e-2, rtol=5e-2)

    print("KERNEL_OK")
</pallas_src>

<mosaic_0001>
module attributes {stable_mosaic.version = 11 : i64} {
  func.func @_proj_kernel(%arg0: i32, %arg1: memref<8x32xf32, #tpu.memory_space<vmem>>, %arg2: memref<32x16xbf16, #tpu.memory_space<vmem>>, %arg3: memref<1x16xf32, #tpu.memory_space<vmem>>, %arg4: memref<8x16xf32, #tpu.memory_space<vmem>>) attributes {dimension_semantics = [#tpu.dimension_semantics<parallel>], iteration_bounds = array<i64: 2>, scalar_prefetch = 0 : i64, scratch_operands = 0 : i64, tpu.core_type = #tpu.core_type<tc>, window_params = [{transform_indices = @transform_0, window_bounds = array<i64: 8, 32>}, {pipeline_mode = #tpu.pipeline_mode<synchronous>, transform_indices = @transform_1, window_bounds = array<i64: 32, 16>}, {pipeline_mode = #tpu.pipeline_mode<synchronous>, transform_indices = @transform_2, window_bounds = array<i64: 1, 16>}, {transform_indices = @transform_3, window_bounds = array<i64: 8, 16>}]} {
    %c0 = arith.constant 0 : index
    %c0_0 = arith.constant 0 : index
    %0 = vector.load %arg1[%c0, %c0_0] : memref<8x32xf32, #tpu.memory_space<vmem>>, vector<8x32xf32>
    %1 = arith.truncf %0 : vector<8x32xf32> to vector<8x32xbf16>
    %c0_1 = arith.constant 0 : index
    %c0_2 = arith.constant 0 : index
    %2 = vector.load %arg2[%c0_1, %c0_2] : memref<32x16xbf16, #tpu.memory_space<vmem>>, vector<32x16xbf16>
    %cst = arith.constant dense<0.000000e+00> : vector<8x16xf32>
    %3 = tpu.matmul %1, %2, %cst {dimension_numbers = #tpu.dot_dimension_numbers<[1], [0], [0], [1], [0, 0, 1, 1], [], []>} : vector<8x32xbf16>, vector<32x16xbf16>, vector<8x16xf32> -> vector<8x16xf32>
    %c0_3 = arith.constant 0 : index
    %c0_4 = arith.constant 0 : index
    %4 = vector.load %arg3[%c0_3, %c0_4] : memref<1x16xf32, #tpu.memory_space<vmem>>, vector<1x16xf32>
    %5 = vector.broadcast %4 : vector<1x16xf32> to vector<8x16xf32>
    %6 = arith.addf %3, %5 : vector<8x16xf32>
    %c0_5 = arith.constant 0 : index
    %c0_6 = arith.constant 0 : index
    %7 = vector.load %arg4[%c0_5, %c0_6] : memref<8x16xf32, #tpu.memory_space<vmem>>, vector<8x16xf32>
    tpu.vector_store %arg4[%c0_5, %c0_6], %6 {strides = array<i32>} : memref<8x16xf32, #tpu.memory_space<vmem>>, vector<8x16xf32>,
    return
  }
  func.func @transform_0(%arg0: i32) -> (i32, i32) {
    %c0_i32 = arith.constant 0 : i32
    %c0_i32_0 = arith.constant 0 : i32
    return %arg0, %c0_i32 : i32, i32
  }
  func.func @transform_1(%arg0: i32) -> (i32, i32) {
    %c0_i32 = arith.constant 0 : i32
    %c0_i32_0 = arith.constant 0 : i32
    %c0_i32_1 = arith.constant 0 : i32
    return %c0_i32, %c0_i32_0 : i32, i32
  }
  func.func @transform_2(%arg0: i32) -> (i32, i32) {
    %c0_i32 = arith.constant 0 : i32
    %c0_i32_0 = arith.constant 0 : i32
    %c0_i32_1 = arith.constant 0 : i32
    return %c0_i32, %c0_i32_0 : i32, i32
  }
  func.func @transform_3(%arg0: i32) -> (i32, i32) {
    %c0_i32 = arith.constant 0 : i32
    %c0_i32_0 = arith.constant 0 : i32
    return %arg0, %c0_i32 : i32, i32
  }
}

</mosaic_0001>

<bundles_post_ra>
// kernel: tpu_custom_call.1
= control target key start
LH: loop header
LB: loop body
LE: loop exit
PB: predicated region body
PF: predicated region fallthrough
CT: control target
= control target key end

     0   :  { %8 = vsyncpa [#allocation3], 0  ;;  %s575_s0 = inlined_call_operand.vmem [shape: f32[16,32], index: 0, kind: input, shape index: {}]   ;;  %s576_s1 = inlined_call_operand.vmem [shape: bf16[32,16], index: 1, kind: input, shape index: {}]   ;;  %s577_s2 = inlined_call_operand.vmem [shape: f32[1,16], index: 2, kind: input, shape index: {}]   ;;  %s578_s3 = inlined_call_operand.hbm [shape: f32[16,16], index: 3, kind: output, shape index: {}]  }
   0x1   :  { %10 = vsyncpa [#allocation3 + $0x1], 0  ;;  %s466_s12 = smov 0   ;;  %s468_s13 = smov 0  }
   0x2   :  { %s470_s14 = smov 0   ;;  %s472_s15 = smov 0  }
   0x3 LB: > { %s487_s16 = sadd.s32 4294967295, %s441_s15   ;;  %s311_s17 = sadd.s32 4294967294, %s441_s15   ;;  %s441_s15 = sphi %s472_s15, %s584_s15   ;;  %s437_s14 = sphi %s470_s14, %s583_s14   ;;  %s433_s13 = sphi %s468_s13, %s582_s13   ;;  %s429_s12 = sphi %s466_s12, %s581_s12  }
   0x4   : > { %s491_s18 = sadd.s32 1, %s441_s15   ;;  %s91_s19 = sadd.s32 1, %s437_s14 }
   0x5   : > { %s88_s20 = ssub.s32 %s441_s15, %s491_s18  ;;  %p101_p0 = scmp.ne.s32.totalorder %s437_s14, %s433_s13 }
   0x6   : > { %p89_p1 = scmp.eq.s32.totalorder %s88_s20, 0  ;;  %p102_p2 = scmp.eq.s32.totalorder %s487_s16, 1 }
   0x7   : > { %p107_p3 = scmp.ne.s32.totalorder %s433_s13, %s429_s12  ;;  %p108_p4 = scmp.eq.s32.totalorder %s311_s17, 1 }
   0x8   : > { %s502_s21 = scalar_select %p89_p1, %s437_s14, %s91_s19  }
   0x9   : > { %p504_p5 = por %p102_p2, %p101_p0  ;;  %p508_p6 = por %p108_p4, %p107_p3 }
   0xa   : > { %p314_p7 = scmp.ge.s32.totalorder %s441_s15, 1  ;;  %p139_p8 = scmp.lt.s32.totalorder %s441_s15, 3 }
   0xc   : > { %p140_p9 = pnand %p314_p7, %p139_p8 }
   0xd   : > { %v377_v0 = vld [vmem:[%s576_s1] sm:$0xff] (!%p140_p9)   ;;  %v443_v1 = vmov (!%p140_p9), 0.0   ;;  %v378_v2 = vld [vmem:[%s576_s1 + $0x8] sm:$0xff] (!%p140_p9)   ;;  %vm444_vm0 = vmmov (!%p140_p9), 0   ;;  %p162_p10 = scmp.lt.s32.totalorder (!%p140_p9), %s487_s16, 1  ;;  %vm192_vm1 = vcmask (!%p140_p9), 261120  }
   0xe   : > { %143 = sbr.rel (%p140_p9) target bundleno = 256 (0x100), region = 32  ;;  %328 = vmatprep.subr.bf16.mxu0 (!%p140_p9), %v443_v1  ;;  %332 = vmatprep.mubr.msk.bf16.mxu0 (!%p140_p9), %vm444_vm0, %v443_v1  ;;  %s159_s6 = sand.u32 (!%p140_p9), 1, %s433_s13   ;;  %v317_v5 = vld [vmem:[%s577_s2] ss:$0 sm:$0xff] (!%p140_p9)  ;;  %vm236_vm2 = vcmask (!%p140_p9), 130048  }
   0xf   : > { %329 = vmatpush3.bf16.msra.mxu0 (!%p140_p9), %v377_v0  ;;  %s315_s7 = sshll.u32 (!%p140_p9), %s159_s6, 3  ;;  %s322_s10 = sshll.u32 (!%p140_p9), %s487_s16, 7 }
  0x10   : > { %330 = vmatprep.subr.bf16.mxu0 (!%p140_p9), %v443_v1  ;;  %s161_s11 = scalar_lea.vmem (!%p140_p9), [#allocation2], %s315_s7  ;;  %s533_s24 = scalar_lea.hbm (!%p140_p9), %s578_s3, %s322_s10 }
  0x11   : > { %s252_s17 = sshll.u32 (!%p140_p9), %s161_s11, 4  ;;  %s445_s26 = smov (!%p140_p9), [#allocation2]   ;;  %s535_s17 = int_to_ptr.vmem [resolvable:$true] %s252_s17 }
  0x12   : > { %s379_s25 = scalar_lea.vmem (!%p140_p9), %s535_s17, 128  ;;  %s383_s27 = sshll.u32 (!%p140_p9), %s445_s26, 4  ;;  %s384_s27 = int_to_ptr.vmem [resolvable:$false] %s383_s27 }
  0x13   : > { %331 = vmatpush3.bf16.msra.mxu0 (!%p140_p9), %v378_v2  ;;  %p380_p11 = scmp.ne.s32.totalorder (!%p140_p9), %s535_s17, %s379_s25  ;;  %p386_p0 = scmp.lt.s32.totalorder (!%p140_p9), %s535_s17, %s384_s27 }
  0x15   : > { %s163_s28 = scalar_select %p162_p10, %s487_s16, 1 }
  0x16   : > { %s239_s16 = scalar_lea.sflag [#allocation3], %s159_s6  ;;  %p381_p12 = pnand %p380_p11, %p504_p5 }
  0x17   : > { %s316_s29 = sshll.u32 %s163_s28, 3  ;;  %s385_s28 = scalar_lea.vmem %s384_s27, 256 }
  0x18   : > { %s165_s5 = scalar_lea.vmem %s575_s0, %s316_s29  ;;  %p382_p13 = pneg %p381_p12 }
  0x19   : > { %v167_v3 = vld [vmem:[%s165_s5] sm:$0xff]  ;;  %p387_p1 = scmp.lt.s32.totalorder %s385_s28, %s379_s25 }
  0x1a   : > { %v168_v4 = vpack.c.bf16 %v167_v3, %v167_v3 }
  0x1b   : > { %p388_p2 = por %p387_p1, %p386_p0 }
  0x1c   : > { %333 = vmatmul.mubr.msk.bf16.vlgmr.msra.gmra.mrb[0].mxu0 %vm192_vm1, %v168_v4 }
  0x1d   : > { %p389_p3 = pnand %p388_p2, %p382_p13 }
  0xef   : > { %v230_v6 = vpop.f32.mrb[0].mxu0 }
  0xf0   : > { %v231_v7 = vadd.f32 %v317_v5, %v230_v6  ;;  %v334_v8 = vpop.f32.mrb[1].mxu0 }
  0xf1   : > { %v233_v9 = vpop.f32.mrb[2].mxu0 }
  0xf2   : > { %v335_v10 = vpop.f32.mrb[3].mxu0  ;;  %237 = vst.msk [vmem:[%s161_s11] sm:$0xff] %vm236_vm2, %v231_v7 }
  0xf3   : > { %392 = shalt.err (!%p389_p3)
}
  0xf4   : > { %s393_s29 = scalar_lea.hbm %s533_s24, 128  ;;  %s397_s5 = scalar_lea.hbm %s578_s3, 256 }
  0xf5   : > { %p394_p4 = scmp.ne.s32.totalorder %s533_s24, %s393_s29  ;;  %p398_p9 = scmp.lt.u32.totalorder %s533_s24, %s578_s3 }
  0xf6   : > { %p399_p10 = scmp.lt.u32.totalorder %s397_s5, %s393_s29  ;;  %p401_p12 = scmp.lt.u32.totalorder %s393_s29, %s533_s24 }
  0xf7   : > { %p395_p7 = pnand %p394_p4, %p504_p5 }
  0xf8   : > { %p400_p11 = por %p399_p10, %p398_p9 }
  0xf9   : > { %p396_p8 = pneg %p395_p7 }
  0xfa   : > { %p402_p13 = por %p401_p12, %p400_p11 }
  0xfc   : > { %p403_p0 = pnand %p402_p13, %p396_p8 }
  0xfe   : > { %406 = shalt.err (!%p403_p0)
}
  0xff   : > { %336 = dma.vmem_to_hbm [thread:$0]  (%p504_p5), %s535_s17, 128, %s533_s24, %s239_s16  }
 0x100 PF: > { %p342_p1 = scmp.ge.s32.totalorder %s441_s15, 2  ;;  %s264_s8 = sand.u32 1, %s429_s12  }
 0x101   : > { %s265_s9 = scalar_lea.sflag [#allocation3], %s264_s8 }
 0x102   : > { %p339_p2 = pnand %p342_p1, %p508_p6 }
 0x104   : > { %424 = dma.done.wait (!%p339_p2), %s265_s9, 128  }
 0x105   : > { %426 = vsyncadd (!%p339_p2), %s265_s9, 4294967168  ;;  %p13_p3 = scmp.ge.s32.totalorder %s491_s18, 4   ;;  %s581_s12 = smov %s433_s13 }
 0x106   : > { %s582_s13 = smov %s437_s14  ;;  %s583_s14 = smov %s502_s21 }
 0x107   : > { %s584_s15 = smov %s491_s18  ;;  %15 = sbr.rel (!%p13_p3) target bundleno = 3 (0x3), region = 67 }
 0x10e   :  { %270 = vsyncpa [#allocation3], 1 }
 0x10f   :  { %272 = vsyncpa [#allocation3 + $0x1], 1 }

</bundles_post_ra>
